<compile_context>
chip_gen: v5e
topology: v5e:2x2
jax: 0.10.0
libtpu: 0.0.40
codegen_flags: <defaults>
</compile_context>

<pallas_src>
from functools import partial

import jax
import jax.numpy as jnp
from jax.experimental import pallas as pl
from jax.experimental.pallas import tpu as pltpu


def _round_up(x, m):
    return ((x + m - 1) // m) * m


def _pad2(arr, rows, cols, dtype):
    arr = arr.astype(dtype)
    return jnp.pad(arr, ((0, rows - arr.shape[0]), (0, cols - arr.shape[1])))


def _choose_n_tiling(n):
    """Pick (n_pad, tm, tk) for the aggregate.

    N is padded up to the chosen tile size instead of letting tiles degrade to
    128x128 (128-class tiles reach ~30% of HBM roofline vs ~85%+ at 512+).
    """
    n_pad = _round_up(n, 128)
    if n_pad <= 512:
        # Tiny graph: one K step; split rows in two when possible so the
        # "parallel" axis can shard across v7x's two TensorCores.
        tm = n_pad // 2 if n_pad >= 256 else n_pad
        return n_pad, tm, n_pad
    if n_pad > 8192:
        # Big graph: 1024x2048 int8 A tiles (2 MiB) amortize per-step overhead.
        n_pad = _round_up(n, 2048)
        return n_pad, 1024, 2048
    n_pad = _round_up(n, 512)
    tk = max(c for c in (2048, 1024, 512) if n_pad % c == 0)
    return n_pad, 512, tk


# --------------------- feature transform: H_s = dinv * (X @ W) ---------------------

def transform_kernel(x_ref, w_ref, dinv_ref, h_ref, acc_ref):
    kf = pl.program_id(1)

    @pl.when(kf == 0)
    def _init():
        acc_ref[...] = jnp.zeros_like(acc_ref)

    acc_ref[...] += jnp.dot(x_ref[...], w_ref[...],
                            preferred_element_type=jnp.float32)

    # Epilogue: fold the first D^{-1/2} row scale into the transform output.
    @pl.when(kf == pl.num_programs(1) - 1)
    def _finalize():
        h_ref[...] = (acc_ref[...] * dinv_ref[...]).astype(h_ref.dtype)


def transform(x_bf16, w_bf16, dinv_col):
    """Rows x K_feat tiled X @ W with f32 accumulator; bf16 in / bf16 out."""
    n_pad, f_pad = x_bf16.shape
    h_pad = w_bf16.shape[1]
    tm = max(c for c in (512, 256, 128) if n_pad % c == 0)
    tkf = max(c for c in (2048, 1024, 512, 256, 128) if f_pad % c == 0)

    flops = 2 * n_pad * f_pad * h_pad
    bytes_accessed = (2 * x_bf16.size
                      + 2 * w_bf16.size * (n_pad // tm)
                      + 4 * dinv_col.size
                      + 2 * n_pad * h_pad)

    return pl.pallas_call(
        transform_kernel,
        out_shape=jax.ShapeDtypeStruct((n_pad, h_pad), jnp.bfloat16),
        grid=(n_pad // tm, f_pad // tkf),
        in_specs=[
            pl.BlockSpec((tm, tkf), lambda i, kf: (i, kf)),      # X tile
            pl.BlockSpec((tkf, h_pad), lambda i, kf: (kf, 0)),   # W tile
            pl.BlockSpec((tm, 1), lambda i, kf: (i, 0)),         # dinv rows
        ],
        out_specs=pl.BlockSpec((tm, h_pad), lambda i, kf: (i, 0)),
        scratch_shapes=[pltpu.VMEM((tm, h_pad), jnp.float32)],
        compiler_params=pltpu.CompilerParams(
            dimension_semantics=("parallel", "arbitrary"),
            vmem_limit_bytes=32 * 1024 * 1024,
        ),
        cost_estimate=pl.CostEstimate(
            flops=flops, transcendentals=0, bytes_accessed=bytes_accessed),
    )(x_bf16, w_bf16, dinv_col)


# --------------------- aggregation: out = dinv * ((A+I) @ H_s) + b -----------------

def aggregate_kernel(a_ref, h_ref, dinv_ref, b_ref, o_ref, acc_ref,
                     *, tk, h_resident):
    k = pl.program_id(1)

    @pl.when(k == 0)
    def _init():
        acc_ref[...] = jnp.zeros_like(acc_ref)

    # int8 -> bf16 upcast on the VPU; hidden under the dominant A DMA.
    a_tile = a_ref[...].astype(jnp.float32).astype(jnp.bfloat16)
    if h_resident:
        start = pl.multiple_of(k * tk, tk)
        h_tile = h_ref[pl.ds(start, tk), :]
    else:
        h_tile = h_ref[...]
    acc_ref[...] += jnp.dot(a_tile, h_tile, preferred_element_type=jnp.float32)

    # Finalize: second D^{-1/2} row scale + bias, exactly once (outside K loop).
    @pl.when(k == pl.num_programs(1) - 1)
    def _finalize():
        o_ref[...] = (acc_ref[...] * dinv_ref[...] + b_ref[...]).astype(o_ref.dtype)


def aggregate(a_i8, h_bf16, dinv_col, bias_f32, *, tm, tk, out_dtype):
    """Tiled (A+I) @ H_s with int8 A streaming, f32 accumulator, row-scale+bias."""
    n_pad = a_i8.shape[0]
    h_pad = h_bf16.shape[1]
    out_isz = jnp.dtype(out_dtype).itemsize

    # VMEM budget (assume double-buffered pipeline allocations everywhere).
    fixed = (2 * tm * tk * 1                 # A int8 tiles
             + 2 * tm * h_pad * out_isz      # output tiles
             + tm * h_pad * 4                # f32 accumulator
             + 2 * tm * 4 + 2 * h_pad * 4)   # dinv / bias
    resident_bytes = 2 * n_pad * h_pad * 2   # whole H_s, bf16
    # Keep resident-H configs comfortably under v7x's 64 MiB physical VMEM.
    h_resident = fixed + resident_bytes <= 40 * 1024 * 1024
    h_bytes = resident_bytes if h_resident else 2 * tk * h_pad * 2
    vmem_limit = int(min(48 * 1024 * 1024,
                         max(32 * 1024 * 1024,
                             fixed + h_bytes + 4 * 1024 * 1024)))

    if h_resident:
        # Constant index_map -> H_s fetched once and pinned for the whole grid
        # (avoids re-streaming H once per row tile).
        h_spec = pl.BlockSpec((n_pad, h_pad), lambda i, k: (0, 0))
    else:
        h_spec = pl.BlockSpec((tk, h_pad), lambda i, k: (k, 0))

    flops = 2 * n_pad * n_pad * h_pad
    bytes_accessed = (a_i8.size                                   # int8 A once
                      + (2 * h_bf16.size if h_resident
                         else 2 * h_bf16.size * (n_pad // tm))
                      + 4 * dinv_col.size + 4 * bias_f32.size
                      + n_pad * h_pad * out_isz)

    return pl.pallas_call(
        partial(aggregate_kernel, tk=tk, h_resident=h_resident),
        out_shape=jax.ShapeDtypeStruct((n_pad, h_pad), out_dtype),
        grid=(n_pad // tm, n_pad // tk),
        in_specs=[
            pl.BlockSpec((tm, tk), lambda i, k: (i, k)),          # A+I tile (int8)
            h_spec,                                               # H_s
            pl.BlockSpec((tm, 1), lambda i, k: (i, 0)),           # dinv rows
            pl.BlockSpec((1, h_pad), lambda i, k: (0, 0)),        # bias (resident)
        ],
        out_specs=pl.BlockSpec((tm, h_pad), lambda i, k: (i, 0)),
        scratch_shapes=[pltpu.VMEM((tm, h_pad), jnp.float32)],
        compiler_params=pltpu.CompilerParams(
            dimension_semantics=("parallel", "arbitrary"),
            vmem_limit_bytes=vmem_limit,
        ),
        cost_estimate=pl.CostEstimate(
            flops=flops, transcendentals=0, bytes_accessed=bytes_accessed),
    )(a_i8, h_bf16, dinv_col, bias_f32)


# --------------------- adjacency build (JAX glue, no N^2 f32 intermediate) ---------

def build_adj_and_dinv(edge_index, num_nodes, n_pad):
    """int8 (A+I) scattered directly into the padded buffer + D^{-1/2} column.

    Scatter-ADD matches PyG's gcn_norm (duplicate edges sum their weights).
    # TODO(synk): PyG uses add_remaining_self_loops (only adds loops to nodes
    # lacking one); identical here for graphs with no pre-existing self-loops.
    """
    src = edge_index[0]
    dst = edge_index[1]
    a = jnp.zeros((n_pad, n_pad), jnp.int8)
    a = a.at[dst, src].add(jnp.ones_like(src, dtype=jnp.int8))
    diag = jnp.arange(num_nodes, dtype=edge_index.dtype)
    a = a.at[diag, diag].add(jnp.ones_like(diag, dtype=jnp.int8))
    # Row degree of (A+I) via an O(E) scatter (no N^2 read-back).
    deg = jnp.zeros((num_nodes,), jnp.float32).at[dst].add(1.0) + 1.0
    dinv = jnp.where(deg > 0.0, jax.lax.rsqrt(deg), 0.0)
    dinv_col = jnp.zeros((n_pad, 1), jnp.float32).at[:num_nodes, 0].set(dinv)
    return a, dinv_col


# --------------------- full forward -------------------------------------------------

def gcn_forward(x, edge_index, params):
    n, feat = x.shape
    hid = params["w1"].shape[1]

    n_pad, tm, tk = _choose_n_tiling(n)
    f_pad = _round_up(feat, 128)
    h_pad = _round_up(hid, 128)

    a_i8, dinv = build_adj_and_dinv(edge_index, n, n_pad)

    x_bf = _pad2(x, n_pad, f_pad, jnp.bfloat16)
    w1 = _pad2(params["w1"], f_pad, h_pad, jnp.bfloat16)
    w2 = _pad2(params["w2"], h_pad, h_pad, jnp.bfloat16)
    b1 = _pad2(params["b1"].reshape(1, -1), 1, h_pad, jnp.float32)
    b2 = _pad2(params["b2"].reshape(1, -1), 1, h_pad, jnp.float32)

    # Layer 1: h1 = dinv*((A+I) @ (dinv*(X W1))) + b1  ==  A_hat @ (X W1) + b1
    hs = transform(x_bf, w1, dinv)
    h1 = aggregate(a_i8, hs, dinv, b1, tm=tm, tk=tk, out_dtype=jnp.bfloat16)
    # Layer 2 (f32 final output)
    hs = transform(h1, w2, dinv)
    out = aggregate(a_i8, hs, dinv, b2, tm=tm, tk=tk, out_dtype=jnp.float32)
    return out[:n, :hid]


def init_params(key, feat_dim, hid_dim):
    k1, k2 = jax.random.split(key)
    s1 = jnp.sqrt(6.0 / (feat_dim + hid_dim))
    s2 = jnp.sqrt(6.0 / (hid_dim + hid_dim))
    return {
        "w1": jax.random.uniform(k1, (feat_dim, hid_dim), jnp.float32, -s1, s1),
        "b1": jnp.zeros((hid_dim,), jnp.float32),
        "w2": jax.random.uniform(k2, (hid_dim, hid_dim), jnp.float32, -s2, s2),
        "b2": jnp.zeros((hid_dim,), jnp.float32),
    }


if __name__ == "__main__":
    num_nodes, feat_dim, hid_dim = 16, 8, 32

    key = jax.random.PRNGKey(0)
    kx, kp = jax.random.split(key)

    # Deterministic node features and an undirected ring graph.
    x = jax.random.normal(kx, (num_nodes, feat_dim), jnp.float32)
    fwd = jnp.arange(num_nodes, dtype=jnp.int32)
    bwd = (fwd + 1) % num_nodes
    edge_index = jnp.stack(
        [jnp.concatenate([fwd, bwd]), jnp.concatenate([bwd, fwd])], axis=0
    )

    params = init_params(kp, feat_dim, hid_dim)

    gcn_jit = jax.jit(gcn_forward)
    out = jax.block_until_ready(gcn_jit(x, edge_index, params))
    assert out.shape == (num_nodes, hid_dim)

    # ---- references ----
    src, dst = edge_index[0], edge_index[1]
    loop = jnp.arange(num_nodes, dtype=jnp.int32)
    a_plus_i = jnp.zeros((num_nodes, num_nodes), jnp.float32).at[
        jnp.concatenate([dst, loop]), jnp.concatenate([src, loop])].add(1.0)
    deg = a_plus_i.sum(axis=1)
    dinv = jnp.where(deg > 0.0, jax.lax.rsqrt(deg), 0.0)
    a_hat = a_plus_i * dinv[:, None] * dinv[None, :]

    # Pure-f32 reference (module semantics).
    ref_f32 = a_hat @ (x @ params["w1"]) + params["b1"]
    ref_f32 = a_hat @ (ref_f32 @ params["w2"]) + params["b2"]

    # Reference mimicking the kernel's int8-A / bf16 / dinv-factored math.
    def mimic_layer(xin, w, b):
        h = jnp.dot(xin.astype(jnp.bfloat16), w.astype(jnp.bfloat16),
                    preferred_element_type=jnp.float32)
        hs = (h * dinv[:, None]).astype(jnp.bfloat16)
        agg = jnp.dot(a_plus_i.astype(jnp.bfloat16), hs,
                      preferred_element_type=jnp.float32)
        return agg * dinv[:, None] + b

    r1 = mimic_layer(x, params["w1"], params["b1"]).astype(jnp.bfloat16)
    ref_mimic = mimic_layer(r1, params["w2"], params["b2"])

    assert jnp.allclose(out, ref_mimic, atol=2e-3, rtol=2e-3), "mismatch vs mimic ref"
    assert jnp.allclose(out, ref_f32, atol=5e-2, rtol=5e-2), "mismatch vs f32 ref"

    print("KERNEL_OK")
</pallas_src>

<mosaic_0001>
module attributes {stable_mosaic.version = 11 : i64} {
  func.func @transform_kernel(%arg0: i32, %arg1: i32, %arg2: memref<128x128xbf16, #tpu.memory_space<vmem>>, %arg3: memref<128x128xbf16, #tpu.memory_space<vmem>>, %arg4: memref<128x1xf32, #tpu.memory_space<vmem>>, %arg5: memref<128x128xbf16, #tpu.memory_space<vmem>>, %arg6: memref<128x128xf32, #tpu.memory_space<vmem>>) attributes {dimension_semantics = [#tpu.dimension_semantics<parallel>, #tpu.dimension_semantics<arbitrary>], iteration_bounds = array<i64: 1, 1>, scalar_prefetch = 0 : i64, scratch_operands = 1 : i64, tpu.core_type = #tpu.core_type<tc>, window_params = [{transform_indices = @transform_0, window_bounds = array<i64: 128, 128>}, {transform_indices = @transform_1, window_bounds = array<i64: 128, 128>}, {transform_indices = @transform_2, window_bounds = array<i64: 128, 1>}, {transform_indices = @transform_3, window_bounds = array<i64: 128, 128>}]} {
    %c0_i32 = arith.constant 0 : i32
    %0 = arith.cmpi eq, %arg1, %c0_i32 : i32
    %1 = arith.extui %0 : i1 to i32
    %c0_i32_0 = arith.constant 0 : i32
    %2 = arith.cmpi ne, %1, %c0_i32_0 : i32
    scf.if %2 {
      %cst_10 = arith.constant 0.000000e+00 : f32
      %12 = vector.broadcast %cst_10 : f32 to vector<128x128xf32>
      %c0_11 = arith.constant 0 : index
      %c0_12 = arith.constant 0 : index
      %13 = vector.load %arg6[%c0_11, %c0_12] : memref<128x128xf32, #tpu.memory_space<vmem>>, vector<128x128xf32>
      tpu.vector_store %arg6[%c0_11, %c0_12], %12 {strides = array<i32>} : memref<128x128xf32, #tpu.memory_space<vmem>>, vector<128x128xf32>,
    } else {
    }
    %c0 = arith.constant 0 : index
    %c0_1 = arith.constant 0 : index
    %3 = vector.load %arg6[%c0, %c0_1] : memref<128x128xf32, #tpu.memory_space<vmem>>, vector<128x128xf32>
    %c0_2 = arith.constant 0 : index
    %c0_3 = arith.constant 0 : index
    %4 = vector.load %arg2[%c0_2, %c0_3] : memref<128x128xbf16, #tpu.memory_space<vmem>>, vector<128x128xbf16>
    %c0_4 = arith.constant 0 : index
    %c0_5 = arith.constant 0 : index
    %5 = vector.load %arg3[%c0_4, %c0_5] : memref<128x128xbf16, #tpu.memory_space<vmem>>, vector<128x128xbf16>
    %cst = arith.constant dense<0.000000e+00> : vector<128x128xf32>
    %6 = tpu.matmul %4, %5, %cst {dimension_numbers = #tpu.dot_dimension_numbers<[1], [0], [0], [1], [0, 0, 1, 1], [], []>} : vector<128x128xbf16>, vector<128x128xbf16>, vector<128x128xf32> -> vector<128x128xf32>
    %7 = arith.addf %3, %6 : vector<128x128xf32>
    %c0_6 = arith.constant 0 : index
    %c0_7 = arith.constant 0 : index
    %8 = vector.load %arg6[%c0_6, %c0_7] : memref<128x128xf32, #tpu.memory_space<vmem>>, vector<128x128xf32>
    tpu.vector_store %arg6[%c0_6, %c0_7], %7 {strides = array<i32>} : memref<128x128xf32, #tpu.memory_space<vmem>>, vector<128x128xf32>,
    %c0_i32_8 = arith.constant 0 : i32
    %9 = arith.cmpi eq, %arg1, %c0_i32_8 : i32
    %10 = arith.extui %9 : i1 to i32
    %c0_i32_9 = arith.constant 0 : i32
    %11 = arith.cmpi ne, %10, %c0_i32_9 : i32
    scf.if %11 {
      %c0_10 = arith.constant 0 : index
      %c0_11 = arith.constant 0 : index
      %12 = vector.load %arg6[%c0_10, %c0_11] : memref<128x128xf32, #tpu.memory_space<vmem>>, vector<128x128xf32>
      %c0_12 = arith.constant 0 : index
      %c0_13 = arith.constant 0 : index
      %13 = vector.load %arg4[%c0_12, %c0_13] : memref<128x1xf32, #tpu.memory_space<vmem>>, vector<128x1xf32>
      %14 = vector.broadcast %13 : vector<128x1xf32> to vector<128x128xf32>
      %15 = arith.mulf %12, %14 : vector<128x128xf32>
      %16 = arith.truncf %15 : vector<128x128xf32> to vector<128x128xbf16>
      %c0_14 = arith.constant 0 : index
      %c0_15 = arith.constant 0 : index
      %17 = vector.load %arg5[%c0_14, %c0_15] : memref<128x128xbf16, #tpu.memory_space<vmem>>, vector<128x128xbf16>
      tpu.vector_store %arg5[%c0_14, %c0_15], %16 {strides = array<i32>} : memref<128x128xbf16, #tpu.memory_space<vmem>>, vector<128x128xbf16>,
    } else {
    }
    return
  }
  func.func @transform_0(%arg0: i32, %arg1: i32) -> (i32, i32) {
    %c0_i32 = arith.constant 0 : i32
    return %arg0, %arg1 : i32, i32
  }
  func.func @transform_1(%arg0: i32, %arg1: i32) -> (i32, i32) {
    %c0_i32 = arith.constant 0 : i32
    %c0_i32_0 = arith.constant 0 : i32
    return %arg1, %c0_i32 : i32, i32
  }
  func.func @transform_2(%arg0: i32, %arg1: i32) -> (i32, i32) {
    %c0_i32 = arith.constant 0 : i32
    %c0_i32_0 = arith.constant 0 : i32
    return %arg0, %c0_i32 : i32, i32
  }
  func.func @transform_3(%arg0: i32, %arg1: i32) -> (i32, i32) {
    %c0_i32 = arith.constant 0 : i32
    %c0_i32_0 = arith.constant 0 : i32
    return %arg0, %c0_i32 : i32, i32
  }
}

module attributes {stable_mosaic.version = 11 : i64} {
  func.func @aggregate_kernel(%arg0: i32, %arg1: i32, %arg2: memref<128x128xi8, #tpu.memory_space<vmem>>, %arg3: memref<128x128xbf16, #tpu.memory_space<vmem>>, %arg4: memref<128x1xf32, #tpu.memory_space<vmem>>, %arg5: memref<1x128xf32, #tpu.memory_space<vmem>>, %arg6: memref<128x128xbf16, #tpu.memory_space<vmem>>, %arg7: memref<128x128xf32, #tpu.memory_space<vmem>>) attributes {dimension_semantics = [#tpu.dimension_semantics<parallel>, #tpu.dimension_semantics<arbitrary>], iteration_bounds = array<i64: 1, 1>, scalar_prefetch = 0 : i64, scratch_operands = 1 : i64, tpu.core_type = #tpu.core_type<tc>, window_params = [{transform_indices = @transform_0, window_bounds = array<i64: 128, 128>}, {pipeline_mode = #tpu.pipeline_mode<synchronous>, transform_indices = @transform_1, window_bounds = array<i64: 128, 128>}, {transform_indices = @transform_2, window_bounds = array<i64: 128, 1>}, {pipeline_mode = #tpu.pipeline_mode<synchronous>, transform_indices = @transform_3, window_bounds = array<i64: 1, 128>}, {transform_indices = @transform_4, window_bounds = array<i64: 128, 128>}]} {
    %c0_i32 = arith.constant 0 : i32
    %0 = arith.cmpi eq, %arg1, %c0_i32 : i32
    %1 = arith.extui %0 : i1 to i32
    %c0_i32_0 = arith.constant 0 : i32
    %2 = arith.cmpi ne, %1, %c0_i32_0 : i32
    scf.if %2 {
      %cst_9 = arith.constant 0.000000e+00 : f32
      %17 = vector.broadcast %cst_9 : f32 to vector<128x128xf32>
      %c0_10 = arith.constant 0 : index
      %c0_11 = arith.constant 0 : index
      %18 = vector.load %arg7[%c0_10, %c0_11] : memref<128x128xf32, #tpu.memory_space<vmem>>, vector<128x128xf32>
      tpu.vector_store %arg7[%c0_10, %c0_11], %17 {strides = array<i32>} : memref<128x128xf32, #tpu.memory_space<vmem>>, vector<128x128xf32>,
    } else {
    }
    %c0 = arith.constant 0 : index
    %c0_1 = arith.constant 0 : index
    %3 = vector.load %arg2[%c0, %c0_1] : memref<128x128xi8, #tpu.memory_space<vmem>>, vector<128x128xi8>
    %4 = arith.sitofp %3 : vector<128x128xi8> to vector<128x128xf32>
    %5 = arith.truncf %4 : vector<128x128xf32> to vector<128x128xbf16>
    %c128_i32 = arith.constant 128 : i32
    %6 = arith.muli %arg1, %c128_i32 : i32
    %7 = tpu.assume_multiple %6, 128 : i32
    %8 = arith.index_cast %7 : i32 to index
    %c0_2 = arith.constant 0 : index
    %9 = vector.load %arg3[%8, %c0_2] : memref<128x128xbf16, #tpu.memory_space<vmem>>, vector<128x128xbf16>
    %c0_3 = arith.constant 0 : index
    %c0_4 = arith.constant 0 : index
    %10 = vector.load %arg7[%c0_3, %c0_4] : memref<128x128xf32, #tpu.memory_space<vmem>>, vector<128x128xf32>
    %cst = arith.constant dense<0.000000e+00> : vector<128x128xf32>
    %11 = tpu.matmul %5, %9, %cst {dimension_numbers = #tpu.dot_dimension_numbers<[1], [0], [0], [1], [0, 0, 1, 1], [], []>} : vector<128x128xbf16>, vector<128x128xbf16>, vector<128x128xf32> -> vector<128x128xf32>
    %12 = arith.addf %10, %11 : vector<128x128xf32>
    %c0_5 = arith.constant 0 : index
    %c0_6 = arith.constant 0 : index
    %13 = vector.load %arg7[%c0_5, %c0_6] : memref<128x128xf32, #tpu.memory_space<vmem>>, vector<128x128xf32>
    tpu.vector_store %arg7[%c0_5, %c0_6], %12 {strides = array<i32>} : memref<128x128xf32, #tpu.memory_space<vmem>>, vector<128x128xf32>,
    %c0_i32_7 = arith.constant 0 : i32
    %14 = arith.cmpi eq, %arg1, %c0_i32_7 : i32
    %15 = arith.extui %14 : i1 to i32
    %c0_i32_8 = arith.constant 0 : i32
    %16 = arith.cmpi ne, %15, %c0_i32_8 : i32
    scf.if %16 {
      %c0_9 = arith.constant 0 : index
      %c0_10 = arith.constant 0 : index
      %17 = vector.load %arg7[%c0_9, %c0_10] : memref<128x128xf32, #tpu.memory_space<vmem>>, vector<128x128xf32>
      %c0_11 = arith.constant 0 : index
      %c0_12 = arith.constant 0 : index
      %18 = vector.load %arg4[%c0_11, %c0_12] : memref<128x1xf32, #tpu.memory_space<vmem>>, vector<128x1xf32>
      %19 = vector.broadcast %18 : vector<128x1xf32> to vector<128x128xf32>
      %20 = arith.mulf %17, %19 : vector<128x128xf32>
      %c0_13 = arith.constant 0 : index
      %c0_14 = arith.constant 0 : index
      %21 = vector.load %arg5[%c0_13, %c0_14] : memref<1x128xf32, #tpu.memory_space<vmem>>, vector<1x128xf32>
      %22 = vector.broadcast %21 : vector<1x128xf32> to vector<128x128xf32>
      %23 = arith.addf %20, %22 : vector<128x128xf32>
      %24 = arith.truncf %23 : vector<128x128xf32> to vector<128x128xbf16>
      %c0_15 = arith.constant 0 : index
      %c0_16 = arith.constant 0 : index
      %25 = vector.load %arg6[%c0_15, %c0_16] : memref<128x128xbf16, #tpu.memory_space<vmem>>, vector<128x128xbf16>
      tpu.vector_store %arg6[%c0_15, %c0_16], %24 {strides = array<i32>} : memref<128x128xbf16, #tpu.memory_space<vmem>>, vector<128x128xbf16>,
    } else {
    }
    return
  }
  func.func @transform_0(%arg0: i32, %arg1: i32) -> (i32, i32) {
    %c0_i32 = arith.constant 0 : i32
    return %arg0, %arg1 : i32, i32
  }
  func.func @transform_1(%arg0: i32, %arg1: i32) -> (i32, i32) {
    %c0_i32 = arith.constant 0 : i32
    %c0_i32_0 = arith.constant 0 : i32
    %c0_i32_1 = arith.constant 0 : i32
    return %c0_i32, %c0_i32_0 : i32, i32
  }
  func.func @transform_2(%arg0: i32, %arg1: i32) -> (i32, i32) {
    %c0_i32 = arith.constant 0 : i32
    %c0_i32_0 = arith.constant 0 : i32
    return %arg0, %c0_i32 : i32, i32
  }
  func.func @transform_3(%arg0: i32, %arg1: i32) -> (i32, i32) {
    %c0_i32 = arith.constant 0 : i32
    %c0_i32_0 = arith.constant 0 : i32
    %c0_i32_1 = arith.constant 0 : i32
    return %c0_i32, %c0_i32_0 : i32, i32
  }
  func.func @transform_4(%arg0: i32, %arg1: i32) -> (i32, i32) {
    %c0_i32 = arith.constant 0 : i32
    %c0_i32_0 = arith.constant 0 : i32
    return %arg0, %c0_i32 : i32, i32
  }
}

module attributes {stable_mosaic.version = 11 : i64} {
  func.func @aggregate_kernel(%arg0: i32, %arg1: i32, %arg2: memref<128x128xi8, #tpu.memory_space<vmem>>, %arg3: memref<128x128xbf16, #tpu.memory_space<vmem>>, %arg4: memref<128x1xf32, #tpu.memory_space<vmem>>, %arg5: memref<1x128xf32, #tpu.memory_space<vmem>>, %arg6: memref<128x128xf32, #tpu.memory_space<vmem>>, %arg7: memref<128x128xf32, #tpu.memory_space<vmem>>) attributes {dimension_semantics = [#tpu.dimension_semantics<parallel>, #tpu.dimension_semantics<arbitrary>], iteration_bounds = array<i64: 1, 1>, scalar_prefetch = 0 : i64, scratch_operands = 1 : i64, tpu.core_type = #tpu.core_type<tc>, window_params = [{transform_indices = @transform_0, window_bounds = array<i64: 128, 128>}, {pipeline_mode = #tpu.pipeline_mode<synchronous>, transform_indices = @transform_1, window_bounds = array<i64: 128, 128>}, {transform_indices = @transform_2, window_bounds = array<i64: 128, 1>}, {pipeline_mode = #tpu.pipeline_mode<synchronous>, transform_indices = @transform_3, window_bounds = array<i64: 1, 128>}, {transform_indices = @transform_4, window_bounds = array<i64: 128, 128>}]} {
    %c0_i32 = arith.constant 0 : i32
    %0 = arith.cmpi eq, %arg1, %c0_i32 : i32
    %1 = arith.extui %0 : i1 to i32
    %c0_i32_0 = arith.constant 0 : i32
    %2 = arith.cmpi ne, %1, %c0_i32_0 : i32
    scf.if %2 {
      %cst_9 = arith.constant 0.000000e+00 : f32
      %17 = vector.broadcast %cst_9 : f32 to vector<128x128xf32>
      %c0_10 = arith.constant 0 : index
      %c0_11 = arith.constant 0 : index
      %18 = vector.load %arg7[%c0_10, %c0_11] : memref<128x128xf32, #tpu.memory_space<vmem>>, vector<128x128xf32>
      tpu.vector_store %arg7[%c0_10, %c0_11], %17 {strides = array<i32>} : memref<128x128xf32, #tpu.memory_space<vmem>>, vector<128x128xf32>,
    } else {
    }
    %c0 = arith.constant 0 : index
    %c0_1 = arith.constant 0 : index
    %3 = vector.load %arg2[%c0, %c0_1] : memref<128x128xi8, #tpu.memory_space<vmem>>, vector<128x128xi8>
    %4 = arith.sitofp %3 : vector<128x128xi8> to vector<128x128xf32>
    %5 = arith.truncf %4 : vector<128x128xf32> to vector<128x128xbf16>
    %c128_i32 = arith.constant 128 : i32
    %6 = arith.muli %arg1, %c128_i32 : i32
    %7 = tpu.assume_multiple %6, 128 : i32
    %8 = arith.index_cast %7 : i32 to index
    %c0_2 = arith.constant 0 : index
    %9 = vector.load %arg3[%8, %c0_2] : memref<128x128xbf16, #tpu.memory_space<vmem>>, vector<128x128xbf16>
    %c0_3 = arith.constant 0 : index
    %c0_4 = arith.constant 0 : index
    %10 = vector.load %arg7[%c0_3, %c0_4] : memref<128x128xf32, #tpu.memory_space<vmem>>, vector<128x128xf32>
    %cst = arith.constant dense<0.000000e+00> : vector<128x128xf32>
    %11 = tpu.matmul %5, %9, %cst {dimension_numbers = #tpu.dot_dimension_numbers<[1], [0], [0], [1], [0, 0, 1, 1], [], []>} : vector<128x128xbf16>, vector<128x128xbf16>, vector<128x128xf32> -> vector<128x128xf32>
    %12 = arith.addf %10, %11 : vector<128x128xf32>
    %c0_5 = arith.constant 0 : index
    %c0_6 = arith.constant 0 : index
    %13 = vector.load %arg7[%c0_5, %c0_6] : memref<128x128xf32, #tpu.memory_space<vmem>>, vector<128x128xf32>
    tpu.vector_store %arg7[%c0_5, %c0_6], %12 {strides = array<i32>} : memref<128x128xf32, #tpu.memory_space<vmem>>, vector<128x128xf32>,
    %c0_i32_7 = arith.constant 0 : i32
    %14 = arith.cmpi eq, %arg1, %c0_i32_7 : i32
    %15 = arith.extui %14 : i1 to i32
    %c0_i32_8 = arith.constant 0 : i32
    %16 = arith.cmpi ne, %15, %c0_i32_8 : i32
    scf.if %16 {
      %c0_9 = arith.constant 0 : index
      %c0_10 = arith.constant 0 : index
      %17 = vector.load %arg7[%c0_9, %c0_10] : memref<128x128xf32, #tpu.memory_space<vmem>>, vector<128x128xf32>
      %c0_11 = arith.constant 0 : index
      %c0_12 = arith.constant 0 : index
      %18 = vector.load %arg4[%c0_11, %c0_12] : memref<128x1xf32, #tpu.memory_space<vmem>>, vector<128x1xf32>
      %19 = vector.broadcast %18 : vector<128x1xf32> to vector<128x128xf32>
      %20 = arith.mulf %17, %19 : vector<128x128xf32>
      %c0_13 = arith.constant 0 : index
      %c0_14 = arith.constant 0 : index
      %21 = vector.load %arg5[%c0_13, %c0_14] : memref<1x128xf32, #tpu.memory_space<vmem>>, vector<1x128xf32>
      %22 = vector.broadcast %21 : vector<1x128xf32> to vector<128x128xf32>
      %23 = arith.addf %20, %22 : vector<128x128xf32>
      %c0_15 = arith.constant 0 : index
      %c0_16 = arith.constant 0 : index
      %24 = vector.load %arg6[%c0_15, %c0_16] : memref<128x128xf32, #tpu.memory_space<vmem>>, vector<128x128xf32>
      tpu.vector_store %arg6[%c0_15, %c0_16], %23 {strides = array<i32>} : memref<128x128xf32, #tpu.memory_space<vmem>>, vector<128x128xf32>,
    } else {
    }
    return
  }
  func.func @transform_0(%arg0: i32, %arg1: i32) -> (i32, i32) {
    %c0_i32 = arith.constant 0 : i32
    return %arg0, %arg1 : i32, i32
  }
  func.func @transform_1(%arg0: i32, %arg1: i32) -> (i32, i32) {
    %c0_i32 = arith.constant 0 : i32
    %c0_i32_0 = arith.constant 0 : i32
    %c0_i32_1 = arith.constant 0 : i32
    return %c0_i32, %c0_i32_0 : i32, i32
  }
  func.func @transform_2(%arg0: i32, %arg1: i32) -> (i32, i32) {
    %c0_i32 = arith.constant 0 : i32
    %c0_i32_0 = arith.constant 0 : i32
    return %arg0, %c0_i32 : i32, i32
  }
  func.func @transform_3(%arg0: i32, %arg1: i32) -> (i32, i32) {
    %c0_i32 = arith.constant 0 : i32
    %c0_i32_0 = arith.constant 0 : i32
    %c0_i32_1 = arith.constant 0 : i32
    return %c0_i32, %c0_i32_0 : i32, i32
  }
  func.func @transform_4(%arg0: i32, %arg1: i32) -> (i32, i32) {
    %c0_i32 = arith.constant 0 : i32
    %c0_i32_0 = arith.constant 0 : i32
    return %arg0, %c0_i32 : i32, i32
  }
}

</mosaic_0001>

<bundles_post_ra>
// kernel: gcn_forward.4
= control target key start
LH: loop header
LB: loop body
LE: loop exit
PB: predicated region body
PF: predicated region fallthrough
CT: control target
= control target key end

     0   :  { %v581_v0 = vmov 0   ;;  %s722_s2 = inlined_call_operand.vmem [shape: f32[128,1], index: 2, kind: input, shape index: {}]   ;;  %s723_s1 = inlined_call_operand.vmem [shape: bf16[128,128], index: 1, kind: input, shape index: {}]   ;;  %s724_s0 = inlined_call_operand.vmem [shape: bf16[128,128], index: 0, kind: input, shape index: {}]   ;;  %s725_s3 = inlined_call_operand.vmem [shape: bf16[128,128], index: 3, kind: output, shape index: {}]  }
   0x1   :  { %578 = vset.pattern.permute.xlu0 %v581_v0  ;;  %v278_v1 = vld [vmem:[%s722_s2] sm:$0xff]  ;;  %v505_v2 = vld [vmem:[%s723_s1 + $0x38] sm:$0xff]  ;;  %579 = vset.pattern.permute.xlu1 %v581_v0  ;;  %v280_v3 = vld [vmem:[%s722_s2 + $0x10] sm:$0xff] }
   0x2   :  { %296 = vperm.xlu0 %578, %v278_v1   ;;  %580 = vset.pattern.permute.xlu2 %v581_v0  ;;  %v504_v4 = vld [vmem:[%s723_s1 + $0x30] sm:$0xff]  ;;  %v279_v5 = vld [vmem:[%s722_s2 + $0x8] sm:$0xff]  ;;  %v282_v7 = vld [vmem:[%s722_s2 + $0x20] sm:$0xff] }
   0x3   :  { %178 = vmatpush.bf16.msra.mxu0 %v505_v2  ;;  %553 = vmatpush.bf16.msra.mxu1 %v505_v2  ;;  %v503_v6 = vld [vmem:[%s723_s1 + $0x28] sm:$0xff]  ;;  %v281_v8 = vld [vmem:[%s722_s2 + $0x18] sm:$0xff]  ;;  %v502_v9 = vld [vmem:[%s723_s1 + $0x20] sm:$0xff] }
   0x4   :  { %554 = vmatpush.bf16.msra.mxu2 %v505_v2  ;;  %555 = vmatpush.bf16.msra.mxu3 %v505_v2  ;;  %v283_v10 = vld [vmem:[%s722_s2 + $0x28] sm:$0xff]  ;;  %v284_v11 = vld [vmem:[%s722_s2 + $0x30] sm:$0xff]  ;;  %v501_v12 = vld [vmem:[%s723_s1 + $0x18] sm:$0xff] }
   0x5   :  { %306 = vperm.xlu1 %579, %v280_v3   ;;  %316 = vperm.xlu2 %580, %v282_v7   ;;  %v285_v13 = vld [vmem:[%s722_s2 + $0x38] sm:$0xff]  ;;  %v500_v14 = vld [vmem:[%s723_s1 + $0x10] sm:$0xff]  ;;  %v286_v15 = vld [vmem:[%s722_s2 + $0x40] sm:$0xff] }
   0x6   :  { %v287_v16 = vld [vmem:[%s722_s2 + $0x48] sm:$0xff]  ;;  %v288_v18 = vld [vmem:[%s722_s2 + $0x50] sm:$0xff]  ;;  %v498_v19 = vld [vmem:[%s723_s1] sm:$0xff] }
   0x7   :  { %179 = vmatpush.bf16.msra.mxu0 %v504_v4  ;;  %556 = vmatpush.bf16.msra.mxu1 %v504_v4  ;;  %v499_v17 = vld [vmem:[%s723_s1 + $0x8] sm:$0xff]  ;;  %v490_v20 = vld [vmem:[%s724_s0] sm:$0xff]  ;;  %v289_v21 = vld [vmem:[%s722_s2 + $0x58] sm:$0xff] }
   0x8   :  { %557 = vmatpush.bf16.msra.mxu2 %v504_v4  ;;  %558 = vmatpush.bf16.msra.mxu3 %v504_v4  ;;  %v290_v22 = vld [vmem:[%s722_s2 + $0x60] sm:$0xff]  ;;  %v492_v23 = vld [vmem:[%s724_s0 + $0x10] sm:$0xff]  ;;  %v291_v26 = vld [vmem:[%s722_s2 + $0x68] sm:$0xff] }
   0x9   :  { %v494_v24 = vld [vmem:[%s724_s0 + $0x20] sm:$0xff]  ;;  %v496_v25 = vld [vmem:[%s724_s0 + $0x30] sm:$0xff]  ;;  %v293_v28 = vld [vmem:[%s722_s2 + $0x78] sm:$0xff] }
   0xa   :  { %301 = vperm.xlu0 %578, %v279_v5   ;;  %v292_v27 = vld [vmem:[%s722_s2 + $0x70] sm:$0xff]  ;;  %v491_v29 = vld [vmem:[%s724_s0 + $0x8] sm:$0xff]  ;;  %v493_v30 = vld [vmem:[%s724_s0 + $0x18] sm:$0xff] }
   0xb   :  { %180 = vmatpush.bf16.msra.mxu0 %v503_v6  ;;  %559 = vmatpush.bf16.msra.mxu1 %v503_v6  ;;  %v495_v31 = vld [vmem:[%s724_s0 + $0x28] sm:$0xff]  ;;  %v497_v32 = vld [vmem:[%s724_s0 + $0x38] sm:$0xff] }
   0xc   :  { %560 = vmatpush.bf16.msra.mxu2 %v503_v6  ;;  %561 = vmatpush.bf16.msra.mxu3 %v503_v6 }
   0xd   :  { %311 = vperm.xlu1 %579, %v281_v8   ;;  %321 = vperm.xlu2 %580, %v283_v10  }
   0xf   :  { %181 = vmatpush.bf16.msra.mxu0 %v502_v9  ;;  %562 = vmatpush.bf16.msra.mxu1 %v502_v9 }
  0x10   :  { %563 = vmatpush.bf16.msra.mxu2 %v502_v9  ;;  %564 = vmatpush.bf16.msra.mxu3 %v502_v9 }
  0x12   :  { %326 = vperm.xlu0 %578, %v284_v11  }
  0x13   :  { %182 = vmatpush.bf16.msra.mxu0 %v501_v12  ;;  %565 = vmatpush.bf16.msra.mxu1 %v501_v12 }
  0x14   :  { %566 = vmatpush.bf16.msra.mxu2 %v501_v12  ;;  %567 = vmatpush.bf16.msra.mxu3 %v501_v12 }
  0x15   :  { %331 = vperm.xlu1 %579, %v285_v13   ;;  %336 = vperm.xlu2 %580, %v286_v15  }
  0x17   :  { %183 = vmatpush.bf16.msra.mxu0 %v500_v14  ;;  %568 = vmatpush.bf16.msra.mxu1 %v500_v14 }
  0x18   :  { %569 = vmatpush.bf16.msra.mxu2 %v500_v14  ;;  %570 = vmatpush.bf16.msra.mxu3 %v500_v14 }
  0x1a   :  { %341 = vperm.xlu0 %578, %v287_v16  }
  0x1b   :  { %184 = vmatpush.bf16.msra.mxu0 %v499_v17  ;;  %571 = vmatpush.bf16.msra.mxu1 %v499_v17 }
  0x1c   :  { %572 = vmatpush.bf16.msra.mxu2 %v499_v17  ;;  %573 = vmatpush.bf16.msra.mxu3 %v499_v17 }
  0x1d   :  { %346 = vperm.xlu1 %579, %v288_v18   ;;  %351 = vperm.xlu2 %580, %v289_v21  }
  0x1f   :  { %185 = vmatpush.bf16.msra.mxu0 %v498_v19  ;;  %574 = vmatpush.bf16.msra.mxu1 %v498_v19 }
  0x20   :  { %575 = vmatpush.bf16.msra.mxu2 %v498_v19  ;;  %576 = vmatpush.bf16.msra.mxu3 %v498_v19 }
  0x22   :  { %356 = vperm.xlu0 %578, %v290_v22   ;;  %186 = vmatmul.bf16.vlgmr.msra.gmra.mxu0 %v490_v20 }
  0x23   :  { %196 = vmatmul.bf16.vlgmr.msra.gmra.mxu1 %v492_v23  ;;  %206 = vmatmul.bf16.vlgmr.msra.gmra.mxu2 %v494_v24 }
  0x24   :  { %216 = vmatmul.bf16.vlgmr.msra.gmra.mxu3 %v496_v25 }
  0x25   :  { %361 = vperm.xlu1 %579, %v291_v26   ;;  %366 = vperm.xlu2 %580, %v292_v27  }
  0x2a   :  { %371 = vperm.xlu0 %578, %v293_v28  }
  0x32   :  { %191 = vmatmul.bf16.gmra.mxu0 %v491_v29 }
  0x33   :  { %201 = vmatmul.bf16.gmra.mxu1 %v493_v30  ;;  %211 = vmatmul.bf16.gmra.mxu2 %v495_v31 }
  0x34   :  { %221 = vmatmul.bf16.gmra.mxu3 %v497_v32 }
  0x5f   :  { %v317_v37 = vpop.permute.xlu2 %316 }
  0x67   :  { %v322_v41 = vpop.permute.xlu2 %321 }
  0x6f   :  { %v337_v53 = vpop.permute.xlu2 %336 }
  0x74   :  { %v297_v33 = vpop.permute.xlu0 %296 }
  0x77   :  { %v307_v34 = vpop.permute.xlu1 %306  ;;  %v352_v4 = vpop.permute.xlu2 %351 }
  0x7c   :  { %v302_v35 = vpop.permute.xlu0 %301 }
  0x7f   :  { %v312_v36 = vpop.permute.xlu1 %311  ;;  %v367_v15 = vpop.permute.xlu2 %366 }
  0x84   :  { %v327_v38 = vpop.permute.xlu0 %326 }
  0x87   :  { %v332_v39 = vpop.permute.xlu1 %331 }
  0x8c   :  { %v342_v43 = vpop.permute.xlu0 %341 }
  0x8f   :  { %v347_v44 = vpop.permute.xlu1 %346 }
  0x94   :  { %v357_v56 = vpop.permute.xlu0 %356 }
  0x97   :  { %v362_v57 = vpop.permute.xlu1 %361 }
  0x9c   :  { %v372_v17 = vpop.permute.xlu0 %371 }
  0x9f   :  { %v187_v40 = vpop.f32.mrf.mxu0 }
  0xa0   :  { %v197_v42 = vpop.f32.mrf.mxu1  ;;  %v374_v48 = vmul.f32 %v297_v33, %v187_v40 }
  0xa1   :  { %v378_v51 = vmul.f32 %v317_v37, %v197_v42 }
  0xa6   :  { %v207_v45 = vpop.f32.mrf.mxu2 }
  0xa7   :  { %v217_v46 = vpop.f32.mrf.mxu3  ;;  %v189_v47 = vpop.f32.mrf.mxu0  ;;  %v382_v59 = vmul.f32 %v337_v53, %v207_v45 }
  0xa8   :  { %v375_v49 = vmul.f32 %v302_v35, %v189_v47  ;;  %v199_v50 = vpop.f32.mrf.mxu1  ;;  %v386_v63 = vmul.f32 %v357_v56, %v217_v46 }
  0xa9   :  { %v379_v52 = vmul.f32 %v322_v41, %v199_v50 }
  0xaa   :  { %v509_v54 = vpack.c.bf16 %v375_v49, %v374_v48 }
  0xab   :  { %v519_v55 = vpack.c.bf16 %v379_v52, %v378_v51 }
  0xac   :  { %510 = vst [vmem:[%s725_s3] sm:$0xff] %v509_v54  }
  0xad   :  { %547 = vst [vmem:[%s725_s3 + $0x10] sm:$0xff] %v519_v55  }
  0xae   :  { %v209_v58 = vpop.f32.mrf.mxu2 }
  0xaf   :  { %v383_v60 = vmul.f32 %v342_v43, %v209_v58  ;;  %v219_v61 = vpop.f32.mrf.mxu3  ;;  %v192_v62 = vpop.f32.mrf.mxu0 }
  0xb0   :  { %v387_v0 = vmul.f32 %v362_v57, %v219_v61  ;;  %v202_v1 = vpop.f32.mrf.mxu1  ;;  %v376_v8 = vmul.f32 %v307_v34, %v192_v62 }
  0xb1   :  { %v529_v2 = vpack.c.bf16 %v383_v60, %v382_v59  ;;  %v380_v11 = vmul.f32 %v327_v38, %v202_v1 }
  0xb2   :  { %v539_v3 = vpack.c.bf16 %v387_v0, %v386_v63 }
  0xb3   :  { %549 = vst [vmem:[%s725_s3 + $0x20] sm:$0xff] %v529_v2  }
  0xb4   :  { %551 = vst [vmem:[%s725_s3 + $0x30] sm:$0xff] %v539_v3  }
  0xb6   :  { %v212_v5 = vpop.f32.mrf.mxu2 }
  0xb7   :  { %v222_v6 = vpop.f32.mrf.mxu3  ;;  %v194_v7 = vpop.f32.mrf.mxu0  ;;  %v384_v18 = vmul.f32 %v347_v44, %v212_v5 }
  0xb8   :  { %v377_v9 = vmul.f32 %v312_v36, %v194_v7  ;;  %v204_v10 = vpop.f32.mrf.mxu1  ;;  %v388_v21 = vmul.f32 %v367_v15, %v222_v6 }
  0xb9   :  { %v381_v12 = vmul.f32 %v332_v39, %v204_v10 }
  0xba   :  { %v514_v13 = vpack.c.bf16 %v377_v9, %v376_v8 }
  0xbb   :  { %v524_v14 = vpack.c.bf16 %v381_v12, %v380_v11 }
  0xbc   :  { %546 = vst [vmem:[%s725_s3 + $0x8] sm:$0xff] %v514_v13  }
  0xbd   :  { %548 = vst [vmem:[%s725_s3 + $0x18] sm:$0xff] %v524_v14  }
  0xbe   :  { %v214_v16 = vpop.f32.mrf.mxu2 }
  0xbf   :  { %v385_v19 = vmul.f32 %v352_v4, %v214_v16  ;;  %v224_v20 = vpop.f32.mrf.mxu3 }
  0xc0   :  { %v389_v22 = vmul.f32 %v372_v17, %v224_v20 }
  0xc1   :  { %v534_v23 = vpack.c.bf16 %v385_v19, %v384_v18 }
  0xc2   :  { %v544_v24 = vpack.c.bf16 %v389_v22, %v388_v21 }
  0xc3   :  { %550 = vst [vmem:[%s725_s3 + $0x28] sm:$0xff] %v534_v23  }
  0xc4   :  { %552 = vst [vmem:[%s725_s3 + $0x38] sm:$0xff] %v544_v24  }

// kernel: gcn_forward.5
= control target key start
LH: loop header
LB: loop body
LE: loop exit
PB: predicated region body
PF: predicated region fallthrough
CT: control target
= control target key end

     0   :  { %v603_v0 = vmov 0   ;;  %s782_s2 = inlined_call_operand.vmem [shape: f32[128,1], index: 2, kind: input, shape index: {}]   ;;  %s783_s1 = inlined_call_operand.vmem [shape: bf16[128,128], index: 1, kind: input, shape index: {}]   ;;  %s784_s0 = inlined_call_operand.vmem [shape: s8[128,128], index: 0, kind: input, shape index: {}]   ;;  %s785_s3 = inlined_call_operand.vmem [shape: f32[1,128], index: 3, kind: input, shape index: {}]   ;;  %s786_s4 = inlined_call_operand.vmem [shape: bf16[128,128], index: 4, kind: output, shape index: {}]  }
   0x1   :  { %599 = vset.pattern.permute.xlu0 %v603_v0  ;;  %v278_v1 = vld [vmem:[%s782_s2] sm:$0xff]  ;;  %v487_v2 = vld [vmem:[%s783_s1 + $0x38] sm:$0xff]  ;;  %600 = vset.pattern.permute.xlu1 %v603_v0  ;;  %v280_v3 = vld [vmem:[%s782_s2 + $0x10] sm:$0xff] }
   0x2   :  { %296 = vperm.xlu0 %599, %v278_v1   ;;  %601 = vset.pattern.permute.xlu2 %v603_v0  ;;  %v486_v4 = vld [vmem:[%s783_s1 + $0x30] sm:$0xff]  ;;  %v279_v5 = vld [vmem:[%s782_s2 + $0x8] sm:$0xff]  ;;  %v282_v7 = vld [vmem:[%s782_s2 + $0x20] sm:$0xff] }
   0x3   :  { %178 = vmatpush.bf16.msra.mxu0 %v487_v2  ;;  %567 = vmatpush.bf16.msra.mxu1 %v487_v2  ;;  %v485_v6 = vld [vmem:[%s783_s1 + $0x28] sm:$0xff]  ;;  %v281_v8 = vld [vmem:[%s782_s2 + $0x18] sm:$0xff]  ;;  %v484_v9 = vld [vmem:[%s783_s1 + $0x20] sm:$0xff] }
   0x4   :  { %568 = vmatpush.bf16.msra.mxu2 %v487_v2  ;;  %569 = vmatpush.bf16.msra.mxu3 %v487_v2  ;;  %v283_v10 = vld [vmem:[%s782_s2 + $0x28] sm:$0xff]  ;;  %v284_v11 = vld [vmem:[%s782_s2 + $0x30] sm:$0xff]  ;;  %v483_v12 = vld [vmem:[%s783_s1 + $0x18] sm:$0xff] }
   0x5   :  { %306 = vperm.xlu1 %600, %v280_v3   ;;  %316 = vperm.xlu2 %601, %v282_v7   ;;  %v285_v13 = vld [vmem:[%s782_s2 + $0x38] sm:$0xff]  ;;  %v482_v14 = vld [vmem:[%s783_s1 + $0x10] sm:$0xff]  ;;  %v674_v15 = vld [vmem:[%s784_s0] sm:$0xff]  }
   0x6   :  { %v679_v16 = vld [vmem:[%s784_s0 + $0x8] sm:$0xff]   ;;  %v684_v17 = vld [vmem:[%s784_s0 + $0x10] sm:$0xff]   ;;  %v689_v18 = vld [vmem:[%s784_s0 + $0x18] sm:$0xff]   ;;  %v537_v19 = vunpack.c.0.s8 %v674_v15  ;;  %v538_v20 = vunpack.c.1.s8 %v674_v15  ;;  %v541_v47 = vunpack.c.2.s8 %v674_v15  ;;  %v542_v48 = vunpack.c.3.s8 %v674_v15 }
   0x7   :  { %179 = vmatpush.bf16.msra.mxu0 %v486_v4  ;;  %570 = vmatpush.bf16.msra.mxu1 %v486_v4  ;;  %v286_v21 = vld [vmem:[%s782_s2 + $0x40] sm:$0xff]  ;;  %v287_v22 = vld [vmem:[%s782_s2 + $0x48] sm:$0xff]  ;;  %v545_v24 = vunpack.c.0.s8 %v679_v16  ;;  %v546_v25 = vunpack.c.1.s8 %v679_v16  ;;  %v553_v26 = vunpack.c.0.s8 %v684_v17  ;;  %v554_v27 = vunpack.c.1.s8 %v684_v17  ;;  %v288_v32 = vld [vmem:[%s782_s2 + $0x50] sm:$0xff] }
   0x8   :  { %571 = vmatpush.bf16.msra.mxu2 %v486_v4  ;;  %572 = vmatpush.bf16.msra.mxu3 %v486_v4  ;;  %v481_v23 = vld [vmem:[%s783_s1 + $0x8] sm:$0xff]  ;;  %v561_v28 = vunpack.c.0.s8 %v689_v18  ;;  %v562_v29 = vunpack.c.1.s8 %v689_v18  ;;  %v69_v30 = vcvt.s32.f32 %v537_v19  ;;  %v70_v31 = vcvt.s32.f32 %v538_v20  ;;  %v480_v33 = vld [vmem:[%s783_s1] sm:$0xff]  ;;  %v289_v41 = vld [vmem:[%s782_s2 + $0x58] sm:$0xff] }
   0x9   :  { %v73_v34 = vcvt.s32.f32 %v545_v24  ;;  %v74_v35 = vcvt.s32.f32 %v546_v25  ;;  %v77_v36 = vcvt.s32.f32 %v553_v26  ;;  %v78_v37 = vcvt.s32.f32 %v554_v27  ;;  %v290_v42 = vld [vmem:[%s782_s2 + $0x60] sm:$0xff]  ;;  %v291_v46 = vld [vmem:[%s782_s2 + $0x68] sm:$0xff]  ;;  %v292_v49 = vld [vmem:[%s782_s2 + $0x70] sm:$0xff] }
   0xa   :  { %301 = vperm.xlu0 %599, %v279_v5   ;;  %v81_v38 = vcvt.s32.f32 %v561_v28  ;;  %v82_v39 = vcvt.s32.f32 %v562_v29  ;;  %v85_v40 = vpack.c.bf16 %v70_v31, %v69_v30  ;;  %v293_v50 = vld [vmem:[%s782_s2 + $0x78] sm:$0xff]  ;;  %v549_v51 = vunpack.c.2.s8 %v679_v16 }
   0xb   :  { %180 = vmatpush.bf16.msra.mxu0 %v485_v6  ;;  %573 = vmatpush.bf16.msra.mxu1 %v485_v6  ;;  %v87_v43 = vpack.c.bf16 %v74_v35, %v73_v34  ;;  %v89_v44 = vpack.c.bf16 %v78_v37, %v77_v36  ;;  %v550_v52 = vunpack.c.3.s8 %v679_v16  ;;  %v557_v53 = vunpack.c.2.s8 %v684_v17 }
   0xc   :  { %574 = vmatpush.bf16.msra.mxu2 %v485_v6  ;;  %575 = vmatpush.bf16.msra.mxu3 %v485_v6  ;;  %v91_v45 = vpack.c.bf16 %v82_v39, %v81_v38  ;;  %v558_v54 = vunpack.c.3.s8 %v684_v17  ;;  %v565_v55 = vunpack.c.2.s8 %v689_v18  ;;  %v566_v56 = vunpack.c.3.s8 %v689_v18  ;;  %v740_v18 = vld [vmem:[%s785_s3] ss:$0 sm:$0xff] }
   0xd   :  { %311 = vperm.xlu1 %600, %v281_v8   ;;  %321 = vperm.xlu2 %601, %v283_v10   ;;  %v71_v57 = vcvt.s32.f32 %v541_v47  ;;  %v72_v58 = vcvt.s32.f32 %v542_v48  ;;  %v75_v59 = vcvt.s32.f32 %v549_v51  ;;  %v76_v60 = vcvt.s32.f32 %v550_v52 }
   0xe   :  { %v79_v61 = vcvt.s32.f32 %v557_v53  ;;  %v80_v62 = vcvt.s32.f32 %v558_v54  ;;  %v83_v63 = vcvt.s32.f32 %v565_v55  ;;  %v84_v0 = vcvt.s32.f32 %v566_v56 }
   0xf   :  { %181 = vmatpush.bf16.msra.mxu0 %v484_v9  ;;  %576 = vmatpush.bf16.msra.mxu1 %v484_v9  ;;  %v86_v1 = vpack.c.bf16 %v72_v58, %v71_v57  ;;  %v88_v2 = vpack.c.bf16 %v76_v60, %v75_v59 }
  0x10   :  { %577 = vmatpush.bf16.msra.mxu2 %v484_v9  ;;  %578 = vmatpush.bf16.msra.mxu3 %v484_v9  ;;  %v90_v3 = vpack.c.bf16 %v80_v62, %v79_v61  ;;  %v92_v4 = vpack.c.bf16 %v84_v0, %v83_v63 }
  0x12   :  { %326 = vperm.xlu0 %599, %v284_v11  }
  0x13   :  { %182 = vmatpush.bf16.msra.mxu0 %v483_v12  ;;  %579 = vmatpush.bf16.msra.mxu1 %v483_v12 }
  0x14   :  { %580 = vmatpush.bf16.msra.mxu2 %v483_v12  ;;  %581 = vmatpush.bf16.msra.mxu3 %v483_v12 }
  0x15   :  { %331 = vperm.xlu1 %600, %v285_v13   ;;  %336 = vperm.xlu2 %601, %v286_v21  }
  0x17   :  { %183 = vmatpush.bf16.msra.mxu0 %v482_v14  ;;  %582 = vmatpush.bf16.msra.mxu1 %v482_v14 }
  0x18   :  { %583 = vmatpush.bf16.msra.mxu2 %v482_v14  ;;  %584 = vmatpush.bf16.msra.mxu3 %v482_v14 }
  0x1a   :  { %341 = vperm.xlu0 %599, %v287_v22  }
  0x1b   :  { %184 = vmatpush.bf16.msra.mxu0 %v481_v23  ;;  %585 = vmatpush.bf16.msra.mxu1 %v481_v23 }
  0x1c   :  { %586 = vmatpush.bf16.msra.mxu2 %v481_v23  ;;  %587 = vmatpush.bf16.msra.mxu3 %v481_v23 }
  0x1d   :  { %346 = vperm.xlu1 %600, %v288_v32   ;;  %351 = vperm.xlu2 %601, %v289_v41  }
  0x1f   :  { %185 = vmatpush.bf16.msra.mxu0 %v480_v33  ;;  %588 = vmatpush.bf16.msra.mxu1 %v480_v33 }
  0x20   :  { %589 = vmatpush.bf16.msra.mxu2 %v480_v33  ;;  %590 = vmatpush.bf16.msra.mxu3 %v480_v33 }
  0x22   :  { %356 = vperm.xlu0 %599, %v290_v42   ;;  %186 = vmatmul.bf16.vlgmr.msra.gmra.mxu0 %v85_v40 }
  0x23   :  { %196 = vmatmul.bf16.vlgmr.msra.gmra.mxu1 %v87_v43  ;;  %206 = vmatmul.bf16.vlgmr.msra.gmra.mxu2 %v89_v44 }
  0x24   :  { %216 = vmatmul.bf16.vlgmr.msra.gmra.mxu3 %v91_v45 }
  0x25   :  { %361 = vperm.xlu1 %600, %v291_v46   ;;  %366 = vperm.xlu2 %601, %v292_v49  }
  0x2a   :  { %371 = vperm.xlu0 %599, %v293_v50  }
  0x32   :  { %191 = vmatmul.bf16.gmra.mxu0 %v86_v1 }
  0x33   :  { %201 = vmatmul.bf16.gmra.mxu1 %v88_v2  ;;  %211 = vmatmul.bf16.gmra.mxu2 %v90_v3 }
  0x34   :  { %221 = vmatmul.bf16.gmra.mxu3 %v92_v4 }
  0x5f   :  { %v317_v9 = vpop.permute.xlu2 %316 }
  0x67   :  { %v322_v12 = vpop.permute.xlu2 %321 }
  0x6f   :  { %v337_v25 = vpop.permute.xlu2 %336 }
  0x74   :  { %v297_v5 = vpop.permute.xlu0 %296 }
  0x77   :  { %v307_v6 = vpop.permute.xlu1 %306  ;;  %v352_v47 = vpop.permute.xlu2 %351 }
  0x7c   :  { %v302_v7 = vpop.permute.xlu0 %301 }
  0x7f   :  { %v312_v8 = vpop.permute.xlu1 %311  ;;  %v367_v63 = vpop.permute.xlu2 %366 }
  0x84   :  { %v327_v10 = vpop.permute.xlu0 %326 }
  0x87   :  { %v332_v11 = vpop.permute.xlu1 %331 }
  0x8c   :  { %v342_v15 = vpop.permute.xlu0 %341 }
  0x8f   :  { %v347_v16 = vpop.permute.xlu1 %346 }
  0x94   :  { %v357_v32 = vpop.permute.xlu0 %356 }
  0x97   :  { %v362_v35 = vpop.permute.xlu1 %361 }
  0x9c   :  { %v372_v4 = vpop.permute.xlu0 %371 }
  0x9f   :  { %v187_v13 = vpop.f32.mrf.mxu0 }
  0xa0   :  { %v197_v14 = vpop.f32.mrf.mxu1  ;;  %v374_v17 = vmul.f32 %v297_v5, %v187_v13 }
  0xa1   :  { %v378_v20 = vmul.f32 %v317_v9, %v197_v14 }
  0xa2   :  { %v394_v27 = vadd.f32 %v740_v18, %v374_v17 }
  0xa3   :  { %v398_v29 = vadd.f32 %v740_v18, %v378_v20 }
  0xa6   :  { %v207_v19 = vpop.f32.mrf.mxu2 }
  0xa7   :  { %v217_v21 = vpop.f32.mrf.mxu3  ;;  %v189_v22 = vpop.f32.mrf.mxu0  ;;  %v382_v33 = vmul.f32 %v337_v25, %v207_v19 }
  0xa8   :  { %v375_v23 = vmul.f32 %v302_v7, %v189_v22  ;;  %v199_v24 = vpop.f32.mrf.mxu1  ;;  %v386_v36 = vmul.f32 %v357_v32, %v217_v21 }
  0xa9   :  { %v379_v26 = vmul.f32 %v322_v12, %v199_v24  ;;  %v402_v43 = vadd.f32 %v740_v18, %v382_v33 }
  0xaa   :  { %v395_v28 = vadd.f32 %v740_v18, %v375_v23  ;;  %v406_v45 = vadd.f32 %v740_v18, %v386_v36 }
  0xab   :  { %v399_v30 = vadd.f32 %v740_v18, %v379_v26 }
  0xac   :  { %v491_v31 = vpack.c.bf16 %v395_v28, %v394_v27 }
  0xad   :  { %v501_v34 = vpack.c.bf16 %v399_v30, %v398_v29 }
  0xae   :  { %492 = vst [vmem:[%s786_s4] sm:$0xff] %v491_v31   ;;  %v209_v37 = vpop.f32.mrf.mxu2 }
  0xaf   :  { %529 = vst [vmem:[%s786_s4 + $0x10] sm:$0xff] %v501_v34   ;;  %v383_v38 = vmul.f32 %v342_v15, %v209_v37  ;;  %v219_v39 = vpop.f32.mrf.mxu3  ;;  %v192_v40 = vpop.f32.mrf.mxu0 }
  0xb0   :  { %v387_v41 = vmul.f32 %v362_v35, %v219_v39  ;;  %v202_v42 = vpop.f32.mrf.mxu1  ;;  %v376_v50 = vmul.f32 %v307_v6, %v192_v40 }
  0xb1   :  { %v403_v44 = vadd.f32 %v740_v18, %v383_v38  ;;  %v380_v52 = vmul.f32 %v327_v10, %v202_v42 }
  0xb2   :  { %v407_v46 = vadd.f32 %v740_v18, %v387_v41  ;;  %v396_v58 = vadd.f32 %v740_v18, %v376_v50 }
  0xb3   :  { %v511_v48 = vpack.c.bf16 %v403_v44, %v402_v43  ;;  %v400_v60 = vadd.f32 %v740_v18, %v380_v52 }
  0xb4   :  { %v521_v49 = vpack.c.bf16 %v407_v46, %v406_v45 }
  0xb5   :  { %531 = vst [vmem:[%s786_s4 + $0x20] sm:$0xff] %v511_v48  }
  0xb6   :  { %533 = vst [vmem:[%s786_s4 + $0x30] sm:$0xff] %v521_v49   ;;  %v212_v51 = vpop.f32.mrf.mxu2 }
  0xb7   :  { %v222_v53 = vpop.f32.mrf.mxu3  ;;  %v194_v54 = vpop.f32.mrf.mxu0  ;;  %v384_v0 = vmul.f32 %v347_v16, %v212_v51 }
  0xb8   :  { %v377_v55 = vmul.f32 %v312_v8, %v194_v54  ;;  %v204_v56 = vpop.f32.mrf.mxu1  ;;  %v388_v2 = vmul.f32 %v367_v63, %v222_v53 }
  0xb9   :  { %v381_v57 = vmul.f32 %v332_v11, %v204_v56  ;;  %v404_v8 = vadd.f32 %v740_v18, %v384_v0 }
  0xba   :  { %v397_v59 = vadd.f32 %v740_v18, %v377_v55  ;;  %v408_v10 = vadd.f32 %v740_v18, %v388_v2 }
  0xbb   :  { %v401_v61 = vadd.f32 %v740_v18, %v381_v57 }
  0xbc   :  { %v496_v62 = vpack.c.bf16 %v397_v59, %v396_v58 }
  0xbd   :  { %v506_v1 = vpack.c.bf16 %v401_v61, %v400_v60 }
  0xbe   :  { %528 = vst [vmem:[%s786_s4 + $0x8] sm:$0xff] %v496_v62   ;;  %v214_v3 = vpop.f32.mrf.mxu2 }
  0xbf   :  { %530 = vst [vmem:[%s786_s4 + $0x18] sm:$0xff] %v506_v1   ;;  %v385_v5 = vmul.f32 %v352_v47, %v214_v3  ;;  %v224_v6 = vpop.f32.mrf.mxu3 }
  0xc0   :  { %v389_v7 = vmul.f32 %v372_v4, %v224_v6 }
  0xc1   :  { %v405_v9 = vadd.f32 %v740_v18, %v385_v5 }
  0xc2   :  { %v409_v11 = vadd.f32 %v740_v18, %v389_v7 }
  0xc3   :  { %v516_v12 = vpack.c.bf16 %v405_v9, %v404_v8 }
  0xc4   :  { %v526_v13 = vpack.c.bf16 %v409_v11, %v408_v10 }
  0xc5   :  { %532 = vst [vmem:[%s786_s4 + $0x28] sm:$0xff] %v516_v12  }
  0xc6   :  { %534 = vst [vmem:[%s786_s4 + $0x38] sm:$0xff] %v526_v13  }

// kernel: gcn_forward.7
= control target key start
LH: loop header
LB: loop body
LE: loop exit
PB: predicated region body
PF: predicated region fallthrough
CT: control target
= control target key end

     0   :  { %v540_v0 = vmov 0   ;;  %s743_s2 = inlined_call_operand.vmem [shape: f32[128,1], index: 2, kind: input, shape index: {}]   ;;  %s744_s1 = inlined_call_operand.vmem [shape: bf16[128,128], index: 1, kind: input, shape index: {}]   ;;  %s745_s0 = inlined_call_operand.vmem [shape: s8[128,128], index: 0, kind: input, shape index: {}]   ;;  %s746_s3 = inlined_call_operand.vmem [shape: f32[1,128], index: 3, kind: input, shape index: {}]   ;;  %s747_s4 = inlined_call_operand.vmem [shape: f32[128,128], index: 4, kind: output, shape index: {}]  }
   0x1   :  { %536 = vset.pattern.permute.xlu0 %v540_v0  ;;  %v278_v1 = vld [vmem:[%s743_s2] sm:$0xff]  ;;  %v471_v2 = vld [vmem:[%s744_s1 + $0x38] sm:$0xff]  ;;  %537 = vset.pattern.permute.xlu1 %v540_v0  ;;  %v280_v3 = vld [vmem:[%s743_s2 + $0x10] sm:$0xff] }
   0x2   :  { %296 = vperm.xlu0 %536, %v278_v1   ;;  %538 = vset.pattern.permute.xlu2 %v540_v0  ;;  %v470_v4 = vld [vmem:[%s744_s1 + $0x30] sm:$0xff]  ;;  %v279_v5 = vld [vmem:[%s743_s2 + $0x8] sm:$0xff]  ;;  %v282_v7 = vld [vmem:[%s743_s2 + $0x20] sm:$0xff] }
   0x3   :  { %178 = vmatpush.bf16.msra.mxu0 %v471_v2  ;;  %504 = vmatpush.bf16.msra.mxu1 %v471_v2  ;;  %v469_v6 = vld [vmem:[%s744_s1 + $0x28] sm:$0xff]  ;;  %v281_v8 = vld [vmem:[%s743_s2 + $0x18] sm:$0xff]  ;;  %v468_v9 = vld [vmem:[%s744_s1 + $0x20] sm:$0xff] }
   0x4   :  { %505 = vmatpush.bf16.msra.mxu2 %v471_v2  ;;  %506 = vmatpush.bf16.msra.mxu3 %v471_v2  ;;  %v283_v10 = vld [vmem:[%s743_s2 + $0x28] sm:$0xff]  ;;  %v284_v11 = vld [vmem:[%s743_s2 + $0x30] sm:$0xff]  ;;  %v467_v12 = vld [vmem:[%s744_s1 + $0x18] sm:$0xff] }
   0x5   :  { %306 = vperm.xlu1 %537, %v280_v3   ;;  %316 = vperm.xlu2 %538, %v282_v7   ;;  %v285_v13 = vld [vmem:[%s743_s2 + $0x38] sm:$0xff]  ;;  %v466_v14 = vld [vmem:[%s744_s1 + $0x10] sm:$0xff]  ;;  %v611_v15 = vld [vmem:[%s745_s0] sm:$0xff]  }
   0x6   :  { %v616_v16 = vld [vmem:[%s745_s0 + $0x8] sm:$0xff]   ;;  %v621_v17 = vld [vmem:[%s745_s0 + $0x10] sm:$0xff]   ;;  %v626_v18 = vld [vmem:[%s745_s0 + $0x18] sm:$0xff]   ;;  %v474_v19 = vunpack.c.0.s8 %v611_v15  ;;  %v475_v20 = vunpack.c.1.s8 %v611_v15  ;;  %v478_v47 = vunpack.c.2.s8 %v611_v15  ;;  %v479_v48 = vunpack.c.3.s8 %v611_v15 }
   0x7   :  { %179 = vmatpush.bf16.msra.mxu0 %v470_v4  ;;  %507 = vmatpush.bf16.msra.mxu1 %v470_v4  ;;  %v286_v21 = vld [vmem:[%s743_s2 + $0x40] sm:$0xff]  ;;  %v287_v22 = vld [vmem:[%s743_s2 + $0x48] sm:$0xff]  ;;  %v482_v24 = vunpack.c.0.s8 %v616_v16  ;;  %v483_v25 = vunpack.c.1.s8 %v616_v16  ;;  %v490_v26 = vunpack.c.0.s8 %v621_v17  ;;  %v491_v27 = vunpack.c.1.s8 %v621_v17  ;;  %v288_v32 = vld [vmem:[%s743_s2 + $0x50] sm:$0xff] }
   0x8   :  { %508 = vmatpush.bf16.msra.mxu2 %v470_v4  ;;  %509 = vmatpush.bf16.msra.mxu3 %v470_v4  ;;  %v465_v23 = vld [vmem:[%s744_s1 + $0x8] sm:$0xff]  ;;  %v498_v28 = vunpack.c.0.s8 %v626_v18  ;;  %v499_v29 = vunpack.c.1.s8 %v626_v18  ;;  %v69_v30 = vcvt.s32.f32 %v474_v19  ;;  %v70_v31 = vcvt.s32.f32 %v475_v20  ;;  %v464_v33 = vld [vmem:[%s744_s1] sm:$0xff]  ;;  %v289_v41 = vld [vmem:[%s743_s2 + $0x58] sm:$0xff] }
   0x9   :  { %v73_v34 = vcvt.s32.f32 %v482_v24  ;;  %v74_v35 = vcvt.s32.f32 %v483_v25  ;;  %v77_v36 = vcvt.s32.f32 %v490_v26  ;;  %v78_v37 = vcvt.s32.f32 %v491_v27  ;;  %v290_v42 = vld [vmem:[%s743_s2 + $0x60] sm:$0xff]  ;;  %v291_v46 = vld [vmem:[%s743_s2 + $0x68] sm:$0xff]  ;;  %v292_v49 = vld [vmem:[%s743_s2 + $0x70] sm:$0xff] }
   0xa   :  { %301 = vperm.xlu0 %536, %v279_v5   ;;  %v81_v38 = vcvt.s32.f32 %v498_v28  ;;  %v82_v39 = vcvt.s32.f32 %v499_v29  ;;  %v85_v40 = vpack.c.bf16 %v70_v31, %v69_v30  ;;  %v293_v50 = vld [vmem:[%s743_s2 + $0x78] sm:$0xff]  ;;  %v486_v51 = vunpack.c.2.s8 %v616_v16 }
   0xb   :  { %180 = vmatpush.bf16.msra.mxu0 %v469_v6  ;;  %510 = vmatpush.bf16.msra.mxu1 %v469_v6  ;;  %v87_v43 = vpack.c.bf16 %v74_v35, %v73_v34  ;;  %v89_v44 = vpack.c.bf16 %v78_v37, %v77_v36  ;;  %v487_v52 = vunpack.c.3.s8 %v616_v16  ;;  %v494_v53 = vunpack.c.2.s8 %v621_v17 }
   0xc   :  { %511 = vmatpush.bf16.msra.mxu2 %v469_v6  ;;  %512 = vmatpush.bf16.msra.mxu3 %v469_v6  ;;  %v91_v45 = vpack.c.bf16 %v82_v39, %v81_v38  ;;  %v495_v54 = vunpack.c.3.s8 %v621_v17  ;;  %v502_v55 = vunpack.c.2.s8 %v626_v18  ;;  %v503_v56 = vunpack.c.3.s8 %v626_v18 }
   0xd   :  { %311 = vperm.xlu1 %537, %v281_v8   ;;  %321 = vperm.xlu2 %538, %v283_v10   ;;  %v71_v57 = vcvt.s32.f32 %v478_v47  ;;  %v72_v58 = vcvt.s32.f32 %v479_v48  ;;  %v75_v59 = vcvt.s32.f32 %v486_v51  ;;  %v76_v60 = vcvt.s32.f32 %v487_v52 }
   0xe   :  { %v79_v61 = vcvt.s32.f32 %v494_v53  ;;  %v80_v62 = vcvt.s32.f32 %v495_v54  ;;  %v83_v63 = vcvt.s32.f32 %v502_v55  ;;  %v84_v0 = vcvt.s32.f32 %v503_v56 }
   0xf   :  { %181 = vmatpush.bf16.msra.mxu0 %v468_v9  ;;  %513 = vmatpush.bf16.msra.mxu1 %v468_v9  ;;  %v86_v1 = vpack.c.bf16 %v72_v58, %v71_v57  ;;  %v88_v2 = vpack.c.bf16 %v76_v60, %v75_v59 }
  0x10   :  { %514 = vmatpush.bf16.msra.mxu2 %v468_v9  ;;  %515 = vmatpush.bf16.msra.mxu3 %v468_v9  ;;  %v90_v3 = vpack.c.bf16 %v80_v62, %v79_v61  ;;  %v92_v4 = vpack.c.bf16 %v84_v0, %v83_v63 }
  0x12   :  { %326 = vperm.xlu0 %536, %v284_v11  }
  0x13   :  { %182 = vmatpush.bf16.msra.mxu0 %v467_v12  ;;  %516 = vmatpush.bf16.msra.mxu1 %v467_v12 }
  0x14   :  { %517 = vmatpush.bf16.msra.mxu2 %v467_v12  ;;  %518 = vmatpush.bf16.msra.mxu3 %v467_v12 }
  0x15   :  { %331 = vperm.xlu1 %537, %v285_v13   ;;  %336 = vperm.xlu2 %538, %v286_v21  }
  0x17   :  { %183 = vmatpush.bf16.msra.mxu0 %v466_v14  ;;  %519 = vmatpush.bf16.msra.mxu1 %v466_v14 }
  0x18   :  { %520 = vmatpush.bf16.msra.mxu2 %v466_v14  ;;  %521 = vmatpush.bf16.msra.mxu3 %v466_v14  ;;  %v677_v14 = vld [vmem:[%s746_s3] ss:$0 sm:$0xff] }
  0x1a   :  { %341 = vperm.xlu0 %536, %v287_v22  }
  0x1b   :  { %184 = vmatpush.bf16.msra.mxu0 %v465_v23  ;;  %522 = vmatpush.bf16.msra.mxu1 %v465_v23 }
  0x1c   :  { %523 = vmatpush.bf16.msra.mxu2 %v465_v23  ;;  %524 = vmatpush.bf16.msra.mxu3 %v465_v23 }
  0x1d   :  { %346 = vperm.xlu1 %537, %v288_v32   ;;  %351 = vperm.xlu2 %538, %v289_v41  }
  0x1f   :  { %185 = vmatpush.bf16.msra.mxu0 %v464_v33  ;;  %525 = vmatpush.bf16.msra.mxu1 %v464_v33 }
  0x20   :  { %526 = vmatpush.bf16.msra.mxu2 %v464_v33  ;;  %527 = vmatpush.bf16.msra.mxu3 %v464_v33 }
  0x22   :  { %356 = vperm.xlu0 %536, %v290_v42   ;;  %186 = vmatmul.bf16.vlgmr.msra.gmra.mxu0 %v85_v40 }
  0x23   :  { %196 = vmatmul.bf16.vlgmr.msra.gmra.mxu1 %v87_v43  ;;  %206 = vmatmul.bf16.vlgmr.msra.gmra.mxu2 %v89_v44 }
  0x24   :  { %216 = vmatmul.bf16.vlgmr.msra.gmra.mxu3 %v91_v45 }
  0x25   :  { %361 = vperm.xlu1 %537, %v291_v46   ;;  %366 = vperm.xlu2 %538, %v292_v49  }
  0x2a   :  { %371 = vperm.xlu0 %536, %v293_v50  }
  0x32   :  { %191 = vmatmul.bf16.gmra.mxu0 %v86_v1 }
  0x33   :  { %201 = vmatmul.bf16.gmra.mxu1 %v88_v2  ;;  %211 = vmatmul.bf16.gmra.mxu2 %v90_v3 }
  0x34   :  { %221 = vmatmul.bf16.gmra.mxu3 %v92_v4 }
  0x5f   :  { %v317_v8 = vpop.permute.xlu2 %316 }
  0x67   :  { %v322_v11 = vpop.permute.xlu2 %321 }
  0x6f   :  { %v337_v19 = vpop.permute.xlu2 %336 }
  0x74   :  { %v297_v5 = vpop.permute.xlu0 %296 }
  0x77   :  { %v307_v6 = vpop.permute.xlu1 %306  ;;  %v352_v36 = vpop.permute.xlu2 %351 }
  0x7c   :  { %v302_v7 = vpop.permute.xlu0 %301 }
  0x7f   :  { %v312_v9 = vpop.permute.xlu1 %311  ;;  %v367_v50 = vpop.permute.xlu2 %366 }
  0x84   :  { %v327_v10 = vpop.permute.xlu0 %326 }
  0x87   :  { %v332_v12 = vpop.permute.xlu1 %331 }
  0x8c   :  { %v342_v13 = vpop.permute.xlu0 %341 }
  0x8f   :  { %v347_v22 = vpop.permute.xlu1 %346 }
  0x94   :  { %v357_v23 = vpop.permute.xlu0 %356 }
  0x97   :  { %v362_v37 = vpop.permute.xlu1 %361 }
  0x9c   :  { %v372_v0 = vpop.permute.xlu0 %371 }
  0x9f   :  { %v187_v15 = vpop.f32.mrf.mxu0 }
  0xa0   :  { %v374_v16 = vmul.f32 %v297_v5, %v187_v15  ;;  %v197_v17 = vpop.f32.mrf.mxu1 }
  0xa1   :  { %v378_v18 = vmul.f32 %v317_v8, %v197_v17 }
  0xa2   :  { %v394_v20 = vadd.f32 %v677_v14, %v374_v16 }
  0xa3   :  { %v398_v21 = vadd.f32 %v677_v14, %v378_v18 }
  0xa4   :  { %410 = vst [vmem:[%s747_s4] sm:$0xff] %v394_v20 }
  0xa5   :  { %414 = vst [vmem:[%s747_s4 + $0x20] sm:$0xff] %v398_v21 }
  0xa6   :  { %v207_v24 = vpop.f32.mrf.mxu2 }
  0xa7   :  { %v382_v25 = vmul.f32 %v337_v19, %v207_v24  ;;  %v217_v26 = vpop.f32.mrf.mxu3  ;;  %v189_v27 = vpop.f32.mrf.mxu0 }
  0xa8   :  { %v386_v28 = vmul.f32 %v357_v23, %v217_v26  ;;  %v375_v29 = vmul.f32 %v302_v7, %v189_v27  ;;  %v199_v30 = vpop.f32.mrf.mxu1 }
  0xa9   :  { %v402_v31 = vadd.f32 %v677_v14, %v382_v25  ;;  %v379_v32 = vmul.f32 %v322_v11, %v199_v30 }
  0xaa   :  { %v406_v33 = vadd.f32 %v677_v14, %v386_v28  ;;  %v395_v34 = vadd.f32 %v677_v14, %v375_v29 }
  0xab   :  { %418 = vst [vmem:[%s747_s4 + $0x40] sm:$0xff] %v402_v31  ;;  %v399_v35 = vadd.f32 %v677_v14, %v379_v32 }
  0xac   :  { %422 = vst [vmem:[%s747_s4 + $0x60] sm:$0xff] %v406_v33 }
  0xad   :  { %411 = vst [vmem:[%s747_s4 + $0x8] sm:$0xff] %v395_v34 }
  0xae   :  { %415 = vst [vmem:[%s747_s4 + $0x28] sm:$0xff] %v399_v35  ;;  %v209_v38 = vpop.f32.mrf.mxu2 }
  0xaf   :  { %v383_v39 = vmul.f32 %v342_v13, %v209_v38  ;;  %v219_v40 = vpop.f32.mrf.mxu3  ;;  %v192_v41 = vpop.f32.mrf.mxu0 }
  0xb0   :  { %v387_v42 = vmul.f32 %v362_v37, %v219_v40  ;;  %v376_v43 = vmul.f32 %v307_v6, %v192_v41  ;;  %v202_v44 = vpop.f32.mrf.mxu1 }
  0xb1   :  { %v403_v45 = vadd.f32 %v677_v14, %v383_v39  ;;  %v380_v46 = vmul.f32 %v327_v10, %v202_v44 }
  0xb2   :  { %v407_v47 = vadd.f32 %v677_v14, %v387_v42  ;;  %v396_v48 = vadd.f32 %v677_v14, %v376_v43 }
  0xb3   :  { %419 = vst [vmem:[%s747_s4 + $0x48] sm:$0xff] %v403_v45  ;;  %v400_v49 = vadd.f32 %v677_v14, %v380_v46 }
  0xb4   :  { %423 = vst [vmem:[%s747_s4 + $0x68] sm:$0xff] %v407_v47 }
  0xb5   :  { %412 = vst [vmem:[%s747_s4 + $0x10] sm:$0xff] %v396_v48 }
  0xb6   :  { %416 = vst [vmem:[%s747_s4 + $0x30] sm:$0xff] %v400_v49  ;;  %v212_v51 = vpop.f32.mrf.mxu2 }
  0xb7   :  { %v384_v52 = vmul.f32 %v347_v22, %v212_v51  ;;  %v222_v53 = vpop.f32.mrf.mxu3  ;;  %v194_v54 = vpop.f32.mrf.mxu0 }
  0xb8   :  { %v388_v55 = vmul.f32 %v367_v50, %v222_v53  ;;  %v377_v56 = vmul.f32 %v312_v9, %v194_v54  ;;  %v204_v57 = vpop.f32.mrf.mxu1 }
  0xb9   :  { %v404_v58 = vadd.f32 %v677_v14, %v384_v52  ;;  %v381_v59 = vmul.f32 %v332_v12, %v204_v57 }
  0xba   :  { %v408_v60 = vadd.f32 %v677_v14, %v388_v55  ;;  %v397_v61 = vadd.f32 %v677_v14, %v377_v56 }
  0xbb   :  { %420 = vst [vmem:[%s747_s4 + $0x50] sm:$0xff] %v404_v58  ;;  %v401_v62 = vadd.f32 %v677_v14, %v381_v59 }
  0xbc   :  { %424 = vst [vmem:[%s747_s4 + $0x70] sm:$0xff] %v408_v60 }
  0xbd   :  { %413 = vst [vmem:[%s747_s4 + $0x18] sm:$0xff] %v397_v61 }
  0xbe   :  { %417 = vst [vmem:[%s747_s4 + $0x38] sm:$0xff] %v401_v62  ;;  %v214_v63 = vpop.f32.mrf.mxu2 }
  0xbf   :  { %v385_v1 = vmul.f32 %v352_v36, %v214_v63  ;;  %v224_v2 = vpop.f32.mrf.mxu3 }
  0xc0   :  { %v389_v3 = vmul.f32 %v372_v0, %v224_v2 }
  0xc1   :  { %v405_v4 = vadd.f32 %v677_v14, %v385_v1 }
  0xc2   :  { %v409_v5 = vadd.f32 %v677_v14, %v389_v3 }
  0xc3   :  { %421 = vst [vmem:[%s747_s4 + $0x58] sm:$0xff] %v405_v4 }
  0xc4   :  { %425 = vst [vmem:[%s747_s4 + $0x78] sm:$0xff] %v409_v5 }

</bundles_post_ra>
